<compile_context>
chip_gen: v6e
topology: v6e:2x2x1
jax: 0.10.0
libtpu: 0.0.40
codegen_flags: <defaults>
</compile_context>

<pallas_src>
import functools

import jax
import jax.numpy as jnp
from jax.experimental import pallas as pl
from jax.experimental.pallas import tpu as pltpu

_MIB = 1024 * 1024
_F32 = 4


def _round_up(x, m):
    return ((x + m - 1) // m) * m


def _hw_params():
    """Per-generation (vmem_limit_bytes, target_input_block_bytes, min_grid_steps)."""
    cap = None
    try:
        cap = int(getattr(pltpu.get_tpu_info(), "vmem_capacity_bytes", 0)) or None
    except Exception:
        cap = None
    kind = ""
    try:
        kind = jax.devices()[0].device_kind.lower()
    except Exception:
        pass
    if (cap is not None and cap <= 96 * _MIB) or "v7" in kind:
        # v7x-class: 64 MiB VMEM per TensorCore, 2 TCs/chip -> keep >=8 grid steps.
        limit = 48 * _MIB
        if cap is not None:
            limit = min(limit, max(cap * 3 // 4, 16 * _MIB))
        return limit, 3 * _MIB, 8
    if "v6" in kind:
        # v6e: 128 MiB VMEM, ~1.4 TB/s HBM -> large tiles shrink per-step overhead.
        return 96 * _MIB, 7 * _MIB, 2
    if "v5e" in kind or "v5 lite" in kind or "v5lite" in kind:
        # v5e: 128 MiB VMEM but ~820 GB/s HBM -> 2-4 MiB tiles already amortize.
        return 32 * _MIB, 3 * _MIB, 2
    # Unknown chip: conservative middle ground.
    return 48 * _MIB, 4 * _MIB, 4


def _block_elems(limit_bytes, target_bytes, itemsize):
    """Max input elements per block from the *true* VMEM footprint.

    Footprint per input element ~= 2x in + 2x out (double-buffered, I/O dtype)
    + ~2 live full-block f32 temporaries (x upcast, xc) inside the kernel.
    """
    budget = max(limit_bytes - 2 * _MIB, 1 * _MIB)
    per_elem = 4 * itemsize + 2 * _F32
    by_vmem = budget // per_elem
    by_target = max(1, target_bytes // itemsize)
    return int(max(1, min(by_vmem, by_target)))


# ----------------------------- channels_last -------------------------------- #

def _ln_channels_last_kernel(x_ref, w_ref, b_ref, o_ref, *, eps):
    x = x_ref[...].astype(jnp.float32)                   # (TM, C)
    mean = jnp.mean(x, axis=-1, keepdims=True)
    xc = x - mean
    var = jnp.mean(xc * xc, axis=-1, keepdims=True)      # biased var == F.layer_norm
    inv = jax.lax.rsqrt(var + eps)                       # EUP slot
    w = w_ref[...].astype(jnp.float32)                   # (1, C)
    b = b_ref[...].astype(jnp.float32)                   # (1, C)
    o_ref[...] = (xc * inv * w + b).astype(o_ref.dtype)


def _ln_lane_segment_kernel(x_ref, w_ref, b_ref, o_ref, *, eps, seg, width):
    """LayerNorm over C-aligned lane segments of a lane-dense (TM, 128) block.

    `seg` rows of the original (M, C) array are packed per 128-lane row; the
    per-segment sum is an exact f32 butterfly (log2(seg) roll/select/add steps)
    — rolls never select a wrapped value because segments are aligned and
    seg | width, so the math matches jnp.mean exactly up to f32 reassociation.
    """
    x = x_ref[...].astype(jnp.float32)                   # (TM, width)
    lane = jax.lax.broadcasted_iota(jnp.int32, x.shape, 1)

    def seg_sum(v):
        s = 1
        while s < seg:
            fwd = pltpu.roll(v, shift=width - s, axis=1)  # lane j <- j + s
            bwd = pltpu.roll(v, shift=s, axis=1)          # lane j <- j - s
            v = v + jnp.where((lane & s) == 0, fwd, bwd)
            s *= 2
        return v

    inv_c = 1.0 / float(seg)
    mean = seg_sum(x) * inv_c
    xc = x - mean
    var = seg_sum(xc * xc) * inv_c
    inv = jax.lax.rsqrt(var + eps)                        # EUP slot
    w = w_ref[...].astype(jnp.float32)                    # (1, width), weight tiled G times
    b = b_ref[...].astype(jnp.float32)
    o_ref[...] = (xc * inv * w + b).astype(o_ref.dtype)


def layer_norm_channels_last(x, weight, bias, *, eps=1e-6, block_rows=None,
                             target_block_bytes=None):
    C = x.shape[-1]
    orig_shape = x.shape
    xm = x.reshape(-1, C)
    M = xm.shape[0]
    itemsize = jnp.dtype(x.dtype).itemsize
    limit, target, min_steps = _hw_params()
    if target_block_bytes is not None:
        target = target_block_bytes
    elems = _block_elems(limit, target, itemsize)

    # Lane-dense fold: for small power-of-two C pack G = 128 // C logical rows
    # per 128-lane row (free row-major reshape, no HBM transpose) so both the
    # DMA and the stores are unmasked full-lane vst's.  Gated at C <= 32 so the
    # XLU roll cost of the segmented reduction stays below the HBM roofline.
    G = 128 // C if (C < 128 and 128 % C == 0) else 1
    fold = (G > 1) and (C <= 32) and (M >= G) and (M % G == 0)
    if fold:
        rows_total, width = M // G, 128
        xk = xm.reshape(rows_total, width)
        wk = jnp.tile(weight.reshape(-1), G).reshape(1, width)
        bk = jnp.tile(bias.reshape(-1), G).reshape(1, width)
        kernel = functools.partial(_ln_lane_segment_kernel, eps=eps, seg=C, width=width)
    else:
        rows_total, width = M, C
        xk = xm
        wk = weight.reshape(1, C)
        bk = bias.reshape(1, C)
        kernel = functools.partial(_ln_channels_last_kernel, eps=eps)

    if block_rows is None:
        rows = max(8, (elems // max(1, width)) // 8 * 8)
        rows = min(rows, _round_up(rows_total, 8))
        # Keep the grid at >= min_steps (v7x: 2 TensorCores + DMA overlap).
        cap = max(8, (-(-rows_total // min_steps)) // 8 * 8)
        rows = max(8, min(rows, cap))
    else:
        rows = int(block_rows)

    grid = (pl.cdiv(rows_total, rows),)                  # ragged last block is OK
    cost = pl.CostEstimate(
        flops=int(9 * M * C),
        transcendentals=int(M),
        bytes_accessed=int(2 * M * C * itemsize + 2 * C * _F32))

    out = pl.pallas_call(
        kernel,
        out_shape=jax.ShapeDtypeStruct((rows_total, width), x.dtype),
        grid=grid,
        in_specs=[
            pl.BlockSpec((rows, width), lambda i: (i, 0)),
            pl.BlockSpec((1, width), lambda i: (0, 0)),
            pl.BlockSpec((1, width), lambda i: (0, 0)),
        ],
        out_specs=pl.BlockSpec((rows, width), lambda i: (i, 0)),
        compiler_params=pltpu.CompilerParams(
            dimension_semantics=("parallel",),
            vmem_limit_bytes=limit),
        cost_estimate=cost,
    )(xk, wk, bk)
    return out.reshape(orig_shape)


# ----------------------------- channels_first ------------------------------- #

def _ln_channels_first_kernel(x_ref, w_ref, b_ref, o_ref, *, eps):
    x = x_ref[...].astype(jnp.float32)                   # (Nb, C, THW)
    u = jnp.mean(x, axis=1, keepdims=True)               # mean over channel axis
    xc = x - u
    s = jnp.mean(xc * xc, axis=1, keepdims=True)
    inv = jax.lax.rsqrt(s + eps)
    w = w_ref[...].astype(jnp.float32)                   # (1, C, 1)
    b = b_ref[...].astype(jnp.float32)                   # (1, C, 1)
    o_ref[...] = (xc * inv * w + b).astype(o_ref.dtype)


def layer_norm_channels_first(x, weight, bias, *, eps=1e-6, target_block_bytes=None):
    N, C, H, W = x.shape
    HW = H * W
    xm = x.reshape(N, C, HW)
    w3 = weight.reshape(1, C, 1)
    b3 = bias.reshape(1, C, 1)
    itemsize = jnp.dtype(x.dtype).itemsize
    limit, target, min_steps = _hw_params()
    if target_block_bytes is not None:
        target = target_block_bytes
    elems = _block_elems(limit, target, itemsize)
    plane = C * HW
    kernel = functools.partial(_ln_channels_first_kernel, eps=eps)
    cost = pl.CostEstimate(
        flops=int(9 * x.size),
        transcendentals=int(N * HW),
        bytes_accessed=int(2 * x.size * itemsize + 2 * C * _F32))

    if plane <= elems:
        # Small spatial plane: fold several batch images into one block.
        # (For HW < 128 — ConvNeXt's 7x7 stage — stores are masked; accepted,
        # see module TODO.)
        nb = int(max(1, min(N, elems // max(1, plane))))
        nb = min(nb, max(1, -(-N // min_steps)))          # keep grid >= min_steps
        grid = (pl.cdiv(N, nb),)                          # ragged batch tail is OK
        x_spec = pl.BlockSpec((nb, C, HW), lambda n: (n, 0, 0))
        p_spec = pl.BlockSpec((1, C, 1), lambda n: (0, 0, 0))
        dims = ("parallel",)
    else:
        # Large spatial plane: tile lane-dense along HW in 128-multiples.
        bhw = max(128, (elems // max(1, C)) // 128 * 128)
        bhw = int(min(bhw, _round_up(HW, 128)))
        need = max(1, -(-min_steps // N))
        if need > 1:
            bhw = int(min(bhw, max(128, (HW // need) // 128 * 128)))
        grid = (N, pl.cdiv(HW, bhw))                      # ragged last HW block is OK
        x_spec = pl.BlockSpec((1, C, bhw), lambda n, j: (n, 0, j))
        p_spec = pl.BlockSpec((1, C, 1), lambda n, j: (0, 0, 0))
        dims = ("parallel", "parallel")

    out = pl.pallas_call(
        kernel,
        out_shape=jax.ShapeDtypeStruct((N, C, HW), x.dtype),
        grid=grid,
        in_specs=[x_spec, p_spec, p_spec],
        out_specs=x_spec,
        compiler_params=pltpu.CompilerParams(
            dimension_semantics=dims,
            vmem_limit_bytes=limit),
        cost_estimate=cost,
    )(xm, w3, b3)
    return out.reshape(N, C, H, W)


# ----------------------------- references ----------------------------------- #

def _ref_channels_last(x, w, b, eps):
    u = jnp.mean(x, axis=-1, keepdims=True)
    s = jnp.mean((x - u) ** 2, axis=-1, keepdims=True)
    return (x - u) / jnp.sqrt(s + eps) * w + b


def _ref_channels_first(x, w, b, eps):
    u = jnp.mean(x, axis=1, keepdims=True)
    s = jnp.mean((x - u) ** 2, axis=1, keepdims=True)
    y = (x - u) / jnp.sqrt(s + eps)
    return w[None, :, None, None] * y + b[None, :, None, None]


if __name__ == "__main__":
    key = jax.random.PRNGKey(0)
    keys = jax.random.split(key, 8)
    eps = 1e-6

    # 1) channels_last, C=4 (folded lane-dense path), weight=ones / bias=zeros.
    C = 4
    w1 = jnp.ones((C,), jnp.float32)
    b1 = jnp.zeros((C,), jnp.float32)
    x1 = jax.random.normal(keys[0], (2, 16, 16, C), jnp.float32)
    o1 = jax.block_until_ready(layer_norm_channels_last(x1, w1, b1, eps=eps))
    r1 = _ref_channels_last(x1, w1, b1, eps)
    assert jnp.allclose(o1, r1, atol=1e-5, rtol=1e-5), "channels_last C=4 mismatch"

    # 2) channels_last folded path, ragged last block, non-trivial affine (C=8).
    C2 = 8
    w2 = jax.random.normal(keys[1], (C2,), jnp.float32)
    b2 = jax.random.normal(keys[2], (C2,), jnp.float32)
    x2 = jax.random.normal(keys[3], (3, 8, 8, C2), jnp.float32)
    o2 = jax.block_until_ready(layer_norm_channels_last(x2, w2, b2, eps=eps))
    r2 = _ref_channels_last(x2, w2, b2, eps)
    assert jnp.allclose(o2, r2, atol=1e-5, rtol=1e-5), "channels_last folded ragged mismatch"

    # 3) channels_last plain path (C=48 is not a divisor of 128), explicit ragged blocks.
    C3 = 48
    w3r = jax.random.normal(keys[4], (C3,), jnp.float32)
    b3r = jax.random.normal(keys[5], (C3,), jnp.float32)
    x3 = jax.random.normal(keys[6], (2, 9, 9, C3), jnp.float32)   # M = 162
    o3 = jax.block_until_ready(
        layer_norm_channels_last(x3, w3r, b3r, eps=eps, block_rows=64))
    r3 = _ref_channels_last(x3, w3r, b3r, eps)
    assert jnp.allclose(o3, r3, atol=1e-5, rtol=1e-5), "channels_last plain mismatch"

    # 4) bf16 I/O through the folded path (compare against the same rounded input).
    x4 = x1.astype(jnp.bfloat16)
    o4 = jax.block_until_ready(layer_norm_channels_last(x4, w1, b1, eps=eps))
    r4 = _ref_channels_last(x4.astype(jnp.float32), w1, b1, eps)
    assert jnp.allclose(o4.astype(jnp.float32), r4, atol=2e-2, rtol=2e-2), \
        "channels_last bf16 mismatch"

    # 5) channels_first, small spatial plane (batch-folded blocks).
    x5 = jax.random.normal(keys[7], (2, C, 16, 16), jnp.float32)
    o5 = jax.block_until_ready(layer_norm_channels_first(x5, w1, b1, eps=eps))
    r5 = _ref_channels_first(x5, w1, b1, eps)
    assert jnp.allclose(o5, r5, atol=1e-5, rtol=1e-5), "channels_first mismatch"

    # 6) channels_first, forced tiny target -> multi-image blocks with ragged tail.
    x6 = jax.random.normal(keys[0], (3, C2, 8, 8), jnp.float32)
    o6 = jax.block_until_ready(
        layer_norm_channels_first(x6, w2, b2, eps=eps, target_block_bytes=4096))
    r6 = _ref_channels_first(x6, w2, b2, eps)
    assert jnp.allclose(o6, r6, atol=1e-5, rtol=1e-5), "channels_first batch-folded mismatch"

    # 7) channels_first, forced HW-tiled (lane-dense) branch.
    x7 = jax.random.normal(keys[1], (1, 8, 16, 128), jnp.float32)
    w7 = jnp.ones((8,), jnp.float32)
    b7 = jnp.zeros((8,), jnp.float32)
    o7 = jax.block_until_ready(
        layer_norm_channels_first(x7, w7, b7, eps=eps, target_block_bytes=16384))
    r7 = _ref_channels_first(x7, w7, b7, eps)
    assert jnp.allclose(o7, r7, atol=1e-5, rtol=1e-5), "channels_first HW-tiled mismatch"

    print("KERNEL_OK")
</pallas_src>

<mosaic_0001>
module attributes {stable_mosaic.version = 11 : i64} {
  func.func @_ln_lane_segment_kernel(%arg0: i32, %arg1: memref<8x128xf32, #tpu.memory_space<vmem>>, %arg2: memref<1x128xf32, #tpu.memory_space<vmem>>, %arg3: memref<1x128xf32, #tpu.memory_space<vmem>>, %arg4: memref<8x128xf32, #tpu.memory_space<vmem>>) attributes {dimension_semantics = [#tpu.dimension_semantics<parallel>], iteration_bounds = array<i64: 2>, scalar_prefetch = 0 : i64, scratch_operands = 0 : i64, tpu.core_type = #tpu.core_type<tc>, window_params = [{transform_indices = @transform_0, window_bounds = array<i64: 8, 128>}, {pipeline_mode = #tpu.pipeline_mode<synchronous>, transform_indices = @transform_1, window_bounds = array<i64: 1, 128>}, {pipeline_mode = #tpu.pipeline_mode<synchronous>, transform_indices = @transform_2, window_bounds = array<i64: 1, 128>}, {transform_indices = @transform_3, window_bounds = array<i64: 8, 128>}]} {
    %c0 = arith.constant 0 : index
    %c0_0 = arith.constant 0 : index
    %0 = vector.load %arg1[%c0, %c0_0] : memref<8x128xf32, #tpu.memory_space<vmem>>, vector<8x128xf32>
    %1 = tpu.iota {dimensions = array<i32: 1>} : vector<8x128xi32>
    %c127_i32 = arith.constant 127 : i32
    %2 = tpu.dynamic_rotate %0 by %c127_i32 dim 1 : vector<8x128xf32>, i32 -> vector<8x128xf32>
    %c1_i32 = arith.constant 1 : i32
    %3 = tpu.dynamic_rotate %0 by %c1_i32 dim 1 : vector<8x128xf32>, i32 -> vector<8x128xf32>
    %c1_i32_1 = arith.constant 1 : i32
    %4 = vector.broadcast %c1_i32_1 : i32 to vector<8x128xi32>
    %5 = arith.andi %1, %4 : vector<8x128xi32>
    %c0_i32 = arith.constant 0 : i32
    %6 = vector.broadcast %c0_i32 : i32 to vector<8x128xi32>
    %7 = arith.cmpi eq, %5, %6 : vector<8x128xi32>
    %8 = arith.select %7, %2, %3 : vector<8x128xi1>, vector<8x128xf32>
    %9 = arith.addf %0, %8 : vector<8x128xf32>
    %c126_i32 = arith.constant 126 : i32
    %10 = tpu.dynamic_rotate %9 by %c126_i32 dim 1 : vector<8x128xf32>, i32 -> vector<8x128xf32>
    %c2_i32 = arith.constant 2 : i32
    %11 = tpu.dynamic_rotate %9 by %c2_i32 dim 1 : vector<8x128xf32>, i32 -> vector<8x128xf32>
    %c2_i32_2 = arith.constant 2 : i32
    %12 = vector.broadcast %c2_i32_2 : i32 to vector<8x128xi32>
    %13 = arith.andi %1, %12 : vector<8x128xi32>
    %c0_i32_3 = arith.constant 0 : i32
    %14 = vector.broadcast %c0_i32_3 : i32 to vector<8x128xi32>
    %15 = arith.cmpi eq, %13, %14 : vector<8x128xi32>
    %16 = arith.select %15, %10, %11 : vector<8x128xi1>, vector<8x128xf32>
    %17 = arith.addf %9, %16 : vector<8x128xf32>
    %cst = arith.constant 2.500000e-01 : f32
    %18 = vector.broadcast %cst : f32 to vector<8x128xf32>
    %19 = arith.mulf %17, %18 : vector<8x128xf32>
    %20 = arith.subf %0, %19 : vector<8x128xf32>
    %21 = arith.mulf %20, %20 : vector<8x128xf32>
    %c127_i32_4 = arith.constant 127 : i32
    %22 = tpu.dynamic_rotate %21 by %c127_i32_4 dim 1 : vector<8x128xf32>, i32 -> vector<8x128xf32>
    %c1_i32_5 = arith.constant 1 : i32
    %23 = tpu.dynamic_rotate %21 by %c1_i32_5 dim 1 : vector<8x128xf32>, i32 -> vector<8x128xf32>
    %c1_i32_6 = arith.constant 1 : i32
    %24 = vector.broadcast %c1_i32_6 : i32 to vector<8x128xi32>
    %25 = arith.andi %1, %24 : vector<8x128xi32>
    %c0_i32_7 = arith.constant 0 : i32
    %26 = vector.broadcast %c0_i32_7 : i32 to vector<8x128xi32>
    %27 = arith.cmpi eq, %25, %26 : vector<8x128xi32>
    %28 = arith.select %27, %22, %23 : vector<8x128xi1>, vector<8x128xf32>
    %29 = arith.addf %21, %28 : vector<8x128xf32>
    %c126_i32_8 = arith.constant 126 : i32
    %30 = tpu.dynamic_rotate %29 by %c126_i32_8 dim 1 : vector<8x128xf32>, i32 -> vector<8x128xf32>
    %c2_i32_9 = arith.constant 2 : i32
    %31 = tpu.dynamic_rotate %29 by %c2_i32_9 dim 1 : vector<8x128xf32>, i32 -> vector<8x128xf32>
    %c2_i32_10 = arith.constant 2 : i32
    %32 = vector.broadcast %c2_i32_10 : i32 to vector<8x128xi32>
    %33 = arith.andi %1, %32 : vector<8x128xi32>
    %c0_i32_11 = arith.constant 0 : i32
    %34 = vector.broadcast %c0_i32_11 : i32 to vector<8x128xi32>
    %35 = arith.cmpi eq, %33, %34 : vector<8x128xi32>
    %36 = arith.select %35, %30, %31 : vector<8x128xi1>, vector<8x128xf32>
    %37 = arith.addf %29, %36 : vector<8x128xf32>
    %cst_12 = arith.constant 2.500000e-01 : f32
    %38 = vector.broadcast %cst_12 : f32 to vector<8x128xf32>
    %39 = arith.mulf %37, %38 : vector<8x128xf32>
    %cst_13 = arith.constant 9.99999997E-7 : f32
    %40 = vector.broadcast %cst_13 : f32 to vector<8x128xf32>
    %41 = arith.addf %39, %40 : vector<8x128xf32>
    %42 = math.rsqrt %41 : vector<8x128xf32>
    %c0_14 = arith.constant 0 : index
    %c0_15 = arith.constant 0 : index
    %43 = vector.load %arg2[%c0_14, %c0_15] : memref<1x128xf32, #tpu.memory_space<vmem>>, vector<1x128xf32>
    %c0_16 = arith.constant 0 : index
    %c0_17 = arith.constant 0 : index
    %44 = vector.load %arg3[%c0_16, %c0_17] : memref<1x128xf32, #tpu.memory_space<vmem>>, vector<1x128xf32>
    %45 = arith.mulf %20, %42 : vector<8x128xf32>
    %46 = vector.broadcast %43 : vector<1x128xf32> to vector<8x128xf32>
    %47 = arith.mulf %45, %46 : vector<8x128xf32>
    %48 = vector.broadcast %44 : vector<1x128xf32> to vector<8x128xf32>
    %49 = arith.addf %47, %48 : vector<8x128xf32>
    %c0_18 = arith.constant 0 : index
    %c0_19 = arith.constant 0 : index
    %50 = vector.load %arg4[%c0_18, %c0_19] : memref<8x128xf32, #tpu.memory_space<vmem>>, vector<8x128xf32>
    tpu.vector_store %arg4[%c0_18, %c0_19], %49 {strides = array<i32>} : memref<8x128xf32, #tpu.memory_space<vmem>>, vector<8x128xf32>,
    return
  }
  func.func @transform_0(%arg0: i32) -> (i32, i32) {
    %c0_i32 = arith.constant 0 : i32
    %c0_i32_0 = arith.constant 0 : i32
    return %arg0, %c0_i32 : i32, i32
  }
  func.func @transform_1(%arg0: i32) -> (i32, i32) {
    %c0_i32 = arith.constant 0 : i32
    %c0_i32_0 = arith.constant 0 : i32
    %c0_i32_1 = arith.constant 0 : i32
    return %c0_i32, %c0_i32_0 : i32, i32
  }
  func.func @transform_2(%arg0: i32) -> (i32, i32) {
    %c0_i32 = arith.constant 0 : i32
    %c0_i32_0 = arith.constant 0 : i32
    %c0_i32_1 = arith.constant 0 : i32
    return %c0_i32, %c0_i32_0 : i32, i32
  }
  func.func @transform_3(%arg0: i32) -> (i32, i32) {
    %c0_i32 = arith.constant 0 : i32
    %c0_i32_0 = arith.constant 0 : i32
    return %arg0, %c0_i32 : i32, i32
  }
}

</mosaic_0001>

<bundles_post_ra>
// kernel: tpu_custom_call.1
= control target key start
LH: loop header
LB: loop body
LE: loop exit
PB: predicated region body
PF: predicated region fallthrough
CT: control target
= control target key end

     0   :  { %8 = vsyncpa [#allocation3], 0  ;;  %s678_s0 = inlined_call_operand.hbm [shape: f32[16,128], index: 0, kind: input, shape index: {}]   ;;  %s679_s1 = inlined_call_operand.vmem [shape: f32[1,128], index: 1, kind: input, shape index: {}]   ;;  %s680_s2 = inlined_call_operand.vmem [shape: f32[1,128], index: 2, kind: input, shape index: {}]   ;;  %s681_s3 = inlined_call_operand.hbm [shape: f32[16,128], index: 3, kind: output, shape index: {}]  }
   0x1   :  { %10 = vsyncpa [#allocation3 + $0x1], 0 }
   0x2   :  { %11 = vsyncpa [#allocation4], 0 }
   0x3   :  { %13 = vsyncpa [#allocation4 + $0x1], 0  ;;  %s511_s12 = smov 0   ;;  %s513_s13 = smov 0  }
   0x4   :  { %s515_s14 = smov 0   ;;  %s517_s15 = smov 0  }
   0x5 LB: > { %s532_s16 = sadd.s32 4294967295, %s483_s15   ;;  %s325_s17 = sadd.s32 4294967294, %s483_s15   ;;  %s483_s15 = sphi %s517_s15, %s702_s15   ;;  %s479_s14 = sphi %s515_s14, %s701_s14   ;;  %s475_s13 = sphi %s513_s13, %s700_s13   ;;  %s471_s12 = sphi %s511_s12, %s699_s12  }
   0x6   : > { %s536_s18 = sadd.s32 1, %s483_s15   ;;  %s26_s19 = sadd.s32 1, %s479_s14 }
   0x7   : > { %s23_s20 = ssub.s32 %s483_s15, %s536_s18  ;;  %p33_p0 = scmp.ne.s32.totalorder %s479_s14, %s475_s13 }
   0x8   : > { %p24_p1 = scmp.eq.s32.totalorder %s23_s20, 0  ;;  %p34_p2 = scmp.eq.s32.totalorder %s483_s15, 0 }
   0x9   : > { %p39_p3 = scmp.ne.s32.totalorder %s475_s13, %s471_s12  ;;  %p40_p4 = scmp.eq.s32.totalorder %s532_s16, 0 }
   0xa   : > { %s548_s21 = scalar_select %p24_p1, %s479_s14, %s26_s19  }
   0xb   : > { %p550_p5 = por %p34_p2, %p33_p0  ;;  %p554_p6 = por %p40_p4, %p39_p3 }
   0xc   : > { %p105_p7 = scmp.eq.s32.totalorder %s532_s16, 1  ;;  %p111_p8 = scmp.eq.s32.totalorder %s325_s17, 1 }
   0xd   : > { %s685_s23 = scalar_select %p554_p6, 1, 0 }
   0xe   : > { %p351_p10 = scmp.lt.s32.totalorder %s483_s15, 2  ;;  %p561_p11 = por %p105_p7, %p33_p0 }
   0xf   : > { %p565_p12 = por %p111_p8, %p39_p3  ;;  %s137_s26 = sand.u32 1, %s479_s14  }
  0x10   : > { %s686_s24 = scalar_select %p561_p11, 1, 0 }
  0x11   : > { %s687_s25 = scalar_select %p565_p12, 1, 0 }
  0x12   : > { %s329_s27 = sshll.u32 %s483_s15, 7  ;;  %s328_s28 = sshll.u32 %s137_s26, 3 }
  0x13   : > { %s574_s4 = scalar_lea.hbm %s678_s0, %s329_s27  ;;  %s141_s5 = scalar_lea.vmem [#allocation2], %s328_s28 }
  0x14   : > { %s148_s6 = sshll.u32 %s141_s5, 4  ;;  %p578_p13 = pnand %p351_p10, %p550_p5  ;;  %s582_s6 = int_to_ptr.vmem [resolvable:$true] %s148_s6 }
  0x15   : > { %s138_s8 = scalar_lea.sflag [#allocation3], %s137_s26  ;;  %s391_s9 = scalar_lea.hbm %s574_s4, 128 }
  0x16   : > { %p392_p2 = scmp.ne.s32.totalorder %s574_s4, %s391_s9  ;;  %p393_p3 = pneg %p578_p13 }
  0x17   : > { %s396_s17 = scalar_lea.hbm %s678_s0, 256  ;;  %p397_p5 = scmp.lt.s32.totalorder %s574_s4, %s678_s0 }
  0x18   : > { %p394_p4 = pnand %p393_p3, %p392_p2  ;;  %p398_p8 = scmp.lt.s32.totalorder %s396_s17, %s391_s9 }
  0x1a   : > { %p395_p7 = pneg %p394_p4  ;;  %p399_p10 = por %p398_p8, %p397_p5 }
  0x1c   : > { %p400_p9 = pnand %p399_p10, %p395_p7 }
  0x1e   : > { %403 = shalt.err (!%p400_p9)
}
  0x1f   : > { %s404_s22 = scalar_lea.vmem %s582_s6, 128  ;;  %s485_s26 = smov [#allocation2]  }
  0x20   : > { %p405_p0 = scmp.ne.s32.totalorder %s582_s6, %s404_s22  ;;  %s409_s27 = sshll.u32 %s485_s26, 4  ;;  %s410_s27 = int_to_ptr.vmem [resolvable:$false] %s409_s27 }
  0x21   : > { %s411_s28 = scalar_lea.vmem %s410_s27, 256  ;;  %p412_p4 = scmp.lt.s32.totalorder %s582_s6, %s410_s27 }
  0x22   : > { %p407_p1 = pnand %p405_p0, %p393_p3  ;;  %p413_p12 = scmp.lt.s32.totalorder %s411_s28, %s404_s22 }
  0x24   : > { %p408_p2 = pneg %p407_p1  ;;  %p414_p11 = por %p413_p12, %p412_p4 }
  0x26   : > { %p415_p6 = pnand %p414_p11, %p408_p2 }
  0x28   : > { %418 = shalt.err (!%p415_p6)
}
  0x29   : > { %346 = dma.hbm_to_vmem [thread:$0]  (!%p578_p13), %s574_s4, 128, %s582_s6, %s138_s8  }
  0x2a   : > { %p689_p9 = scmp.lt.s32.totalorder %s483_s15, 3  ;;  %p690_p7 = scmp.ge.s32.totalorder %s483_s15, 1 }
  0x2c   : > { %p154_p0 = pnand %p690_p7, %p689_p9 }
  0x2d   : > { %s609_s29 = sand.u32 (!%p154_p0), 1, %s475_s13   ;;  %p691_p6 = scmp.ne.s32.totalorder (!%p154_p0), %s685_s23, 0 }
  0x2e   : > { %157 = sbr.rel (%p154_p0) target bundleno = 576 (0x240), region = 32  ;;  %s331_s30 = sshll.u32 (!%p154_p0), %s609_s29, 3 }
  0x2f   : > { %s160_s5 = scalar_lea.sflag (!%p154_p0), [#allocation3], %s609_s29  ;;  %s163_s7 = scalar_lea.vmem (!%p154_p0), [#allocation2], %s331_s30 }
  0x33   : > { %462 = dma.done.wait (%p691_p6), %s160_s5, 128  }
  0x34   : > { %464 = vsyncadd (%p691_p6), %s160_s5, 4294967168  ;;  %v186_v0 = vld [vmem:[%s163_s7] sm:$0xff]  ;;  %s486_s4 = smov 127   ;;  %s487_s6 = smov 1   ;;  %v187_v1 = vlaneseq }
  0x35   : > { %189 = vrot.lane.b32.xlu0 %v186_v0, %s486_s4  ;;  %s488_s23 = smov 126   ;;  %s489_s8 = smov 2   ;;  %v333_v29 = vld [vmem:[%s679_s1] ss:$0 sm:$0xff] }
  0x36   : > { %v188_v2 = vand.u32 127, %v187_v1  ;;  %v334_v31 = vld [vmem:[%s680_s2] ss:$0 sm:$0xff]  ;;  %s336_s19 = sshll.u32 %s532_s16, 7  ;;  %s185_s20 = scalar_lea.vmem [#allocation5], %s331_s30 }
  0x37   : > { %s255_s22 = sshll.u32 %s185_s20, 4  ;;  %s253_s28 = scalar_lea.hbm %s681_s3, %s336_s19  ;;  %s256_s22 = int_to_ptr.vmem [resolvable:$true] %s255_s22 }
  0x38   : > { %v193_v3 = vand.u32 1, %v188_v2  ;;  %v201_v9 = vand.u32 2, %v188_v2  ;;  %s242_s5 = scalar_lea.sflag [#allocation4], %s609_s29  ;;  %s419_s7 = scalar_lea.vmem %s256_s22, 128 }
  0x39   : > { %191 = vrot.lane.b32.xlu0 %v186_v0, %s487_s6  ;;  %p420_p11 = scmp.ne.s32.totalorder %s256_s22, %s419_s7  ;;  %p696_p12 = scmp.ne.s32.totalorder %s686_s24, 0 }
  0x3a   : > { %vm619_vm0 = vcmp.eq.s32.totalorder %v193_v3, 0  ;;  %vm625_vm1 = vcmp.eq.s32.totalorder %v201_v9, 0 }
  0x3b   : > { %p421_p13 = pnand %p420_p11, %p696_p12 }
  0x3d   : > { %p422_p1 = pneg %p421_p13 }
  0xa7   : > { %v190_v4 = vpop.permute.xlu0 %189 }
  0xab   : > { %v192_v6 = vpop.permute.xlu0 %191 }
  0xac   : > { %v195_v7 = vsel %vm619_vm0, %v190_v4, %v192_v6 }
  0xad   : > { %v196_v8 = vadd.f32 %v195_v7, %v186_v0 }
  0xaf   : > { %197 = vrot.lane.b32.xlu1 %v196_v8, %s488_s23 }
  0xb3   : > { %199 = vrot.lane.b32.xlu1 %v196_v8, %s489_s8 }
 0x121   : > { %v198_v10 = vpop.permute.xlu1 %197 }
 0x125   : > { %v200_v12 = vpop.permute.xlu1 %199 }
 0x126   : > { %v203_v13 = vsel %vm625_vm1, %v198_v10, %v200_v12 }
 0x127   : > { %v204_v14 = vadd.f32 %v203_v13, %v196_v8 }
 0x129   : > { %v205_v15 = vmul.f32 0.25, %v204_v14 }
 0x12b   : > { %v206_v16 = vsub.f32 %v186_v0, %v205_v15 }
 0x12d   : > { %v207_v17 = vmul.f32 %v206_v16, %v206_v16 }
 0x12f   : > { %210 = vrot.lane.b32.xlu1 %v207_v17, %s487_s6  ;;  %208 = vrot.lane.b32.xlu0 %v207_v17, %s486_s4  ;;  %s490_s4 = smov [#allocation5]  }
 0x130   : > { %s423_s6 = sshll.u32 %s490_s4, 4  ;;  %s424_s6 = int_to_ptr.vmem [resolvable:$false] %s423_s6 }
 0x131   : > { %s425_s16 = scalar_lea.vmem %s424_s6, 256  ;;  %p426_p3 = scmp.lt.s32.totalorder %s256_s22, %s424_s6 }
 0x132   : > { %p427_p5 = scmp.lt.s32.totalorder %s425_s16, %s419_s7 }
 0x134   : > { %p428_p8 = por %p427_p5, %p426_p3 }
 0x136   : > { %p429_p10 = pnand %p428_p8, %p422_p1 }
 0x1a1   : > { %v211_v18 = vpop.permute.xlu1 %210  ;;  %v209_v19 = vpop.permute.xlu0 %208 }
 0x1a2   : > { %v212_v20 = vsel %vm619_vm0, %v209_v19, %v211_v18 }
 0x1a3   : > { %v213_v21 = vadd.f32 %v212_v20, %v207_v17 }
 0x1a5   : > { %216 = vrot.lane.b32.xlu1 %v213_v21, %s489_s8  ;;  %214 = vrot.lane.b32.xlu0 %v213_v21, %s488_s23 }
 0x217   : > { %v217_v22 = vpop.permute.xlu1 %216  ;;  %v215_v23 = vpop.permute.xlu0 %214 }
 0x218   : > { %v218_v24 = vsel %vm625_vm1, %v215_v23, %v217_v22 }
 0x219   : > { %v219_v25 = vadd.f32 %v218_v24, %v213_v21 }
 0x21b   : > { %v220_v26 = vmul.f32 0.25, %v219_v25 }
 0x21d   : > { %v221_v27 = vadd.f32 1e-06, %v220_v26 }
 0x21f   : > { %389 = vrsqrt.f32 %v221_v27 }
 0x22c   : > { %v390_v28 = vpop.eup %389 }
 0x22d   : > { %v225_v30 = vmul.f32 %v390_v28, %v206_v16 }
 0x22f   : > { %v232_v32 = vmul.f32 %v333_v29, %v225_v30 }
 0x231   : > { %v239_v33 = vadd.f32 %v334_v31, %v232_v32 }
 0x233   : > { %240 = vst [vmem:[%s185_s20] sm:$0xff] %v239_v33 }
 0x234   : > { %432 = shalt.err (!%p429_p10)
}
 0x235   : > { %s433_s30 = scalar_lea.hbm %s253_s28, 128  ;;  %s437_s8 = scalar_lea.hbm %s681_s3, 256 }
 0x236   : > { %p434_p2 = scmp.ne.s32.totalorder %s253_s28, %s433_s30  ;;  %p438_p7 = scmp.lt.s32.totalorder %s253_s28, %s681_s3 }
 0x237   : > { %p439_p0 = scmp.lt.s32.totalorder %s437_s8, %s433_s30 }
 0x238   : > { %p435_p4 = pnand %p434_p2, %p696_p12 }
 0x239   : > { %p440_p6 = por %p439_p0, %p438_p7 }
 0x23a   : > { %p436_p9 = pneg %p435_p4 }
 0x23c   : > { %p441_p11 = pnand %p440_p6, %p436_p9 }
 0x23e   : > { %444 = shalt.err (!%p441_p11)
}
 0x23f   : > { %341 = dma.vmem_to_hbm [thread:$0]  (%p696_p12), %s256_s22, 128, %s253_s28, %s242_s5  }
 0x240 PF: > { %s267_s11 = sand.u32 1, %s471_s12   ;;  %p697_p13 = scmp.ne.s32.totalorder %s687_s25, 0 }
 0x241   : > { %p698_p1 = scmp.ge.s32.totalorder %s483_s15, 2  ;;  %s268_s17 = scalar_lea.sflag [#allocation4], %s267_s11 }
 0x243   : > { %p348_p3 = pnand %p698_p1, %p697_p13 }
 0x245   : > { %p349_p5 = pneg %p348_p3 }
 0x247   : > { %466 = dma.done.wait (%p349_p5), %s268_s17, 128  }
 0x248   : > { %468 = vsyncadd (%p349_p5), %s268_s17, 4294967168  ;;  %p16_p8 = scmp.ge.s32.totalorder %s536_s18, 4   ;;  %s699_s12 = smov %s475_s13 }
 0x249   : > { %s700_s13 = smov %s479_s14  ;;  %s701_s14 = smov %s548_s21 }
 0x24a   : > { %s702_s15 = smov %s536_s18  ;;  %18 = sbr.rel (!%p16_p8) target bundleno = 5 (0x5), region = 77 }
 0x24f   :  { %273 = vsyncpa [#allocation3], 1 }
 0x250   :  { %275 = vsyncpa [#allocation3 + $0x1], 1 }
 0x251   :  { %276 = vsyncpa [#allocation4], 1 }
 0x252   :  { %278 = vsyncpa [#allocation4 + $0x1], 1 }

</bundles_post_ra>
